<compile_context>
chip_gen: v7x
topology: tpu7x:2x2x1
jax: 0.10.0
libtpu: 0.0.40
codegen_flags: <defaults>
</compile_context>

<pallas_src>
import functools

import jax
import jax.numpy as jnp
from jax.experimental import pallas as pl
from jax.experimental.pallas import tpu as pltpu


# ---------------------------------------------------------------------------
# "Config" (mirrors BaseConfig.model.{encoder,state_decoder})
# ---------------------------------------------------------------------------
OBS_DIM = 16
ACTION_DIM = 8
OBS_EMBED_DIM = 32
ACTION_EMBED_DIM = 16
VAE_HIDDEN_DIM = 32
DECODER_LAYERS = (64, 32)   # state_decoder.layers

BATCH = 2
SEQ = 8

# ---------------------------------------------------------------------------
# Packed layouts
# ---------------------------------------------------------------------------
PAD = 128                                   # lane width of the 128-wide slabs
D_IN = OBS_DIM + ACTION_DIM                 # 24  -> [obs | actions]
COL_LAT = 32                                # column where latent starts in x
D_X = COL_LAT + VAE_HIDDEN_DIM              # 64  -> [obs|act|0|latent] width
H0, H1 = DECODER_LAYERS                     # 64, 32
D_EMB = OBS_EMBED_DIM + ACTION_EMBED_DIM    # 48

# w_front: (64, 256) block-diagonal  [Ws | Wa | 0]  ++  [0 | W0_latent]
# w_rest : (384, 128) = [W0_embed ; W1 ; Wout], each padded to (128, 128)
R_W0E = 0
R_W1 = PAD
R_WOUT = 2 * PAD
R_REST = 3 * PAD

ROW_ALIGN = 16   # safe for f32 (8,128) and bf16 (16,128) tiles


def _round_up(x, m):
    return ((x + m - 1) // m) * m


# ---------------------------------------------------------------------------
# Kernel
# ---------------------------------------------------------------------------
def _decoder_kernel(x_ref, wf_ref, wr_ref, b_ref, out_ref, *, compute_dtype):
    f32 = jnp.float32
    cdt = compute_dtype

    x = x_ref[...].astype(cdt)               # (tile, 64): [obs|act|0|latent]

    wf = wf_ref[...]                          # (64, 256) front block-diagonal
    w0e = wr_ref[R_W0E:R_W0E + PAD, :]        # (128, 128) embed -> H0
    w1 = wr_ref[R_W1:R_W1 + PAD, :]           # (128, 128) H0 -> H1
    wout = wr_ref[R_WOUT:R_WOUT + PAD, :]     # (128, 128) H1 -> OBS_DIM

    # Fused front end: one 256-wide dot covers both encoders AND the latent
    # part of fc_layers[0]. Split at the vreg-aligned lane-128 boundary.
    y = jnp.dot(x, wf, preferred_element_type=f32)             # (tile, 256)
    embed = jnp.maximum(y[:, :PAD] + b_ref[0:1, :], 0.0)       # [obs_e|act_e|0]
    h_lat = y[:, PAD:]                                         # latent @ W0_lat

    # fc_layers[0]: relu(embed @ W0_embed + latent @ W0_latent + b0)
    h = jnp.maximum(
        jnp.dot(embed.astype(cdt), w0e, preferred_element_type=f32)
        + h_lat + b_ref[1:2, :], 0.0)

    # fc_layers[1]
    h = jnp.maximum(
        jnp.dot(h.astype(cdt), w1, preferred_element_type=f32) + b_ref[2:3, :],
        0.0)

    # fc_out (no activation). Lane-dense 128-wide store; lanes >= OBS_DIM pad.
    out_ref[...] = (jnp.dot(h.astype(cdt), wout, preferred_element_type=f32)
                    + b_ref[3:4, :]).astype(out_ref.dtype)


# ---------------------------------------------------------------------------
# Parameter packing -- call ONCE at init, reuse the slabs across all calls.
# Weights stored (in_features, out_features).
# ---------------------------------------------------------------------------
def pack_params(params, compute_dtype=jnp.float32):
    ws, bs, wa, ba, w0, b0, w1, b1, wout, bout = params

    wf = jnp.zeros((D_X, 2 * PAD), jnp.float32)
    # encoders: rows = [obs|act|0], cols 0..47 of the first 128 lanes
    wf = wf.at[0:OBS_DIM, 0:OBS_EMBED_DIM].set(ws)
    wf = wf.at[OBS_DIM:D_IN,
               OBS_EMBED_DIM:OBS_EMBED_DIM + ACTION_EMBED_DIM].set(wa)
    # latent part of fc_layers[0]: rows 32..63, lanes 128..128+H0
    wf = wf.at[COL_LAT:COL_LAT + VAE_HIDDEN_DIM, PAD:PAD + H0].set(
        w0[:VAE_HIDDEN_DIM])

    wr = jnp.zeros((R_REST, PAD), jnp.float32)
    # embed part of fc_layers[0] (concat order: latent | obs_embed | act_embed)
    wr = wr.at[R_W0E:R_W0E + D_EMB, 0:H0].set(w0[VAE_HIDDEN_DIM:])
    wr = wr.at[R_W1:R_W1 + H0, 0:H1].set(w1)
    wr = wr.at[R_WOUT:R_WOUT + H1, 0:OBS_DIM].set(wout)

    b = jnp.zeros((8, PAD), jnp.float32)          # biases stay f32 (f32 epilogues)
    b = b.at[0, 0:OBS_EMBED_DIM].set(bs)
    b = b.at[0, OBS_EMBED_DIM:OBS_EMBED_DIM + ACTION_EMBED_DIM].set(ba)
    b = b.at[1, 0:H0].set(b0)
    b = b.at[2, 0:H1].set(b1)
    b = b.at[3, 0:OBS_DIM].set(bout)

    return {
        "w_front": wf.astype(compute_dtype),
        "w_rest": wr.astype(compute_dtype),
        "b_slab": b,
        "compute_dtype": compute_dtype,
    }


# ---------------------------------------------------------------------------
# Row tiling: big tiles; >= 2 grid blocks once n > 256 (v7x megacore).
# ---------------------------------------------------------------------------
def _choose_row_tiling(n, row_tile):
    if n <= 256:
        n_pad = _round_up(n, ROW_ALIGN)
        return n_pad, n_pad
    tile = min(_round_up(row_tile, ROW_ALIGN),
               _round_up((n + 1) // 2, ROW_ALIGN))
    n_pad = _round_up(n, tile)
    return tile, n_pad


# ---------------------------------------------------------------------------
# Wrapper
# ---------------------------------------------------------------------------
def state_transition_decoder_forward(latent_state, obs, actions, packed, *,
                                     row_tile=1024, out_dtype=None,
                                     return_padded=False):
    """Fused forward. Inputs (..., feature); output (..., OBS_DIM).

    `packed` is the result of pack_params() (built once at init).
    If return_padded=True the raw (n_pad, 128) kernel output is returned
    (rows >= n and lanes >= OBS_DIM are padding) so consumers can fuse the
    slice themselves and skip an extra HBM pass.
    """
    compute_dtype = packed["compute_dtype"]
    if out_dtype is None:
        out_dtype = compute_dtype

    lead_shape = latent_state.shape[:-1]
    n = 1
    for d in lead_shape:
        n *= d

    obs2d = obs.reshape(n, OBS_DIM).astype(jnp.float32)
    act2d = actions.reshape(n, ACTION_DIM).astype(jnp.float32)
    lat2d = latent_state.reshape(n, VAE_HIDDEN_DIM).astype(jnp.float32)

    tile, n_pad = _choose_row_tiling(n, row_tile)
    grid_rows = n_pad // tile

    # Single (n_pad, 64) activation slab: [obs | act | 0 | latent], f32.
    # Activations stay f32 (single-use); only resident weights may be bf16.
    x2d = jnp.concatenate(
        [obs2d, act2d, jnp.zeros((n, COL_LAT - D_IN), jnp.float32), lat2d],
        axis=-1)
    if n_pad > n:
        x2d = jnp.concatenate(
            [x2d, jnp.zeros((n_pad - n, D_X), jnp.float32)], axis=0)

    kernel = functools.partial(_decoder_kernel, compute_dtype=compute_dtype)

    out = pl.pallas_call(
        kernel,
        out_shape=jax.ShapeDtypeStruct((n_pad, PAD), out_dtype),
        grid_spec=pltpu.PrefetchScalarGridSpec(
            num_scalar_prefetch=0,
            grid=(grid_rows,),
            in_specs=[
                pl.BlockSpec((tile, D_X), lambda i: (i, 0)),      # activations
                pl.BlockSpec((D_X, 2 * PAD), lambda i: (0, 0)),   # w_front: resident
                pl.BlockSpec((R_REST, PAD), lambda i: (0, 0)),    # w_rest:  resident
                pl.BlockSpec((8, PAD), lambda i: (0, 0)),         # biases:  resident
            ],
            out_specs=pl.BlockSpec((tile, PAD), lambda i: (i, 0)),
        ),
        compiler_params=pltpu.CompilerParams(
            dimension_semantics=("parallel",)),  # v7x: rows shard over both TCs
    )(x2d, packed["w_front"], packed["w_rest"], packed["b_slab"])

    if return_padded:
        # TODO(synk): consumers taking the padded slab must mask rows >= n.
        return out
    return out[:n, :OBS_DIM].reshape(*lead_shape, OBS_DIM)


# ---------------------------------------------------------------------------
# Params / reference
# ---------------------------------------------------------------------------
def init_params(key):
    """Deterministic parameter init; weights stored (in_features, out_features)."""
    def linear(key, fan_in, fan_out):
        kw, kb = jax.random.split(key)
        bound = 1.0 / jnp.sqrt(fan_in)
        w = jax.random.uniform(kw, (fan_in, fan_out), jnp.float32, -bound, bound)
        b = jax.random.uniform(kb, (fan_out,), jnp.float32, -bound, bound)
        return w, b

    keys = jax.random.split(key, 5)
    ws, bs = linear(keys[0], OBS_DIM, OBS_EMBED_DIM)                 # state_encoder
    wa, ba = linear(keys[1], ACTION_DIM, ACTION_EMBED_DIM)           # action_encoder
    in0 = VAE_HIDDEN_DIM + OBS_EMBED_DIM + ACTION_EMBED_DIM
    w0, b0 = linear(keys[2], in0, DECODER_LAYERS[0])                 # fc_layers[0]
    w1, b1 = linear(keys[3], DECODER_LAYERS[0], DECODER_LAYERS[1])   # fc_layers[1]
    wout, bout = linear(keys[4], DECODER_LAYERS[1], OBS_DIM)         # fc_out
    return (ws, bs, wa, ba, w0, b0, w1, b1, wout, bout)


def reference_forward(latent_state, obs, actions, params):
    (ws, bs, wa, ba, w0, b0, w1, b1, wout, bout) = params
    obs_e = jax.nn.relu(obs @ ws + bs)
    act_e = jax.nn.relu(actions @ wa + ba)
    h = jnp.concatenate([latent_state, obs_e, act_e], axis=-1)
    h = jax.nn.relu(h @ w0 + b0)
    h = jax.nn.relu(h @ w1 + b1)
    return h @ wout + bout


if __name__ == "__main__":
    key = jax.random.PRNGKey(0)
    k_lat, k_obs, k_act, k_params, k2 = jax.random.split(key, 5)

    latent_state = jax.random.normal(k_lat, (BATCH, SEQ, VAE_HIDDEN_DIM), jnp.float32)
    obs = jax.random.normal(k_obs, (BATCH, SEQ, OBS_DIM), jnp.float32)
    actions = jax.random.normal(k_act, (BATCH, SEQ, ACTION_DIM), jnp.float32)
    params = init_params(k_params)

    # Pack once at init (hoisted per perf review), reuse across calls.
    packed_f32 = pack_params(params, jnp.float32)
    packed_bf16 = pack_params(params, jnp.bfloat16)

    # --- f32 path: tight check against the pure-JAX reference -----------------
    out = state_transition_decoder_forward(latent_state, obs, actions, packed_f32)
    out = jax.block_until_ready(out)
    ref = reference_forward(latent_state, obs, actions, params)
    assert out.shape == (BATCH, SEQ, OBS_DIM)
    assert jnp.allclose(out, ref, atol=1e-4, rtol=1e-4), "f32 Pallas kernel mismatch"

    # --- bf16 weights (f32 activations in, f32 accumulation, bf16 output) -----
    out_bf16 = state_transition_decoder_forward(
        latent_state, obs, actions, packed_bf16)
    out_bf16 = jax.block_until_ready(out_bf16).astype(jnp.float32)
    rnd = lambda x: x.astype(jnp.bfloat16).astype(jnp.float32)
    params_r = tuple(rnd(p) for p in params)
    ref_bf16 = reference_forward(rnd(latent_state), rnd(obs), rnd(actions), params_r)
    assert jnp.allclose(out_bf16, ref_bf16, atol=5e-2, rtol=5e-2), \
        "bf16 Pallas kernel mismatch"

    # --- larger batch: exercises the multi-block grid (>= 2 blocks, padding) --
    kl, ko, ka = jax.random.split(k2, 3)
    lat_big = jax.random.normal(kl, (2, 320, VAE_HIDDEN_DIM), jnp.float32)
    obs_big = jax.random.normal(ko, (2, 320, OBS_DIM), jnp.float32)
    act_big = jax.random.normal(ka, (2, 320, ACTION_DIM), jnp.float32)
    out_big = state_transition_decoder_forward(lat_big, obs_big, act_big, packed_f32)
    out_big = jax.block_until_ready(out_big)
    ref_big = reference_forward(lat_big, obs_big, act_big, params)
    assert out_big.shape == (2, 320, OBS_DIM)
    assert jnp.allclose(out_big, ref_big, atol=1e-4, rtol=1e-4), \
        "f32 multi-block Pallas kernel mismatch"

    print("KERNEL_OK")
</pallas_src>

<mosaic_0001>
module attributes {stable_mosaic.version = 11 : i64} {
  func.func @_decoder_kernel(%arg0: i32, %arg1: memref<16x64xf32, #tpu.memory_space<vmem>>, %arg2: memref<64x256xf32, #tpu.memory_space<vmem>>, %arg3: memref<384x128xf32, #tpu.memory_space<vmem>>, %arg4: memref<8x128xf32, #tpu.memory_space<vmem>>, %arg5: memref<16x128xf32, #tpu.memory_space<vmem>>) attributes {dimension_semantics = [#tpu.dimension_semantics<parallel>], iteration_bounds = array<i64: 1>, scalar_prefetch = 0 : i64, scratch_operands = 0 : i64, tpu.core_type = #tpu.core_type<tc>, window_params = [{transform_indices = @transform_0, window_bounds = array<i64: 16, 64>}, {pipeline_mode = #tpu.pipeline_mode<synchronous>, transform_indices = @transform_1, window_bounds = array<i64: 64, 256>}, {pipeline_mode = #tpu.pipeline_mode<synchronous>, transform_indices = @transform_2, window_bounds = array<i64: 384, 128>}, {pipeline_mode = #tpu.pipeline_mode<synchronous>, transform_indices = @transform_3, window_bounds = array<i64: 8, 128>}, {transform_indices = @transform_4, window_bounds = array<i64: 16, 128>}]} {
    %c0 = arith.constant 0 : index
    %c0_0 = arith.constant 0 : index
    %0 = vector.load %arg1[%c0, %c0_0] : memref<16x64xf32, #tpu.memory_space<vmem>>, vector<16x64xf32>
    %c0_1 = arith.constant 0 : index
    %c0_2 = arith.constant 0 : index
    %1 = vector.load %arg2[%c0_1, %c0_2] : memref<64x256xf32, #tpu.memory_space<vmem>>, vector<64x256xf32>
    %c0_3 = arith.constant 0 : index
    %c0_4 = arith.constant 0 : index
    %2 = vector.load %arg3[%c0_3, %c0_4] : memref<384x128xf32, #tpu.memory_space<vmem>>, vector<128x128xf32>
    %c128 = arith.constant 128 : index
    %c0_5 = arith.constant 0 : index
    %3 = vector.load %arg3[%c128, %c0_5] : memref<384x128xf32, #tpu.memory_space<vmem>>, vector<128x128xf32>
    %c256 = arith.constant 256 : index
    %c0_6 = arith.constant 0 : index
    %4 = vector.load %arg3[%c256, %c0_6] : memref<384x128xf32, #tpu.memory_space<vmem>>, vector<128x128xf32>
    %cst = arith.constant dense<0.000000e+00> : vector<16x256xf32>
    %5 = tpu.matmul %0, %1, %cst {dimension_numbers = #tpu.dot_dimension_numbers<[1], [0], [0], [1], [0, 0, 1, 1], [], []>} : vector<16x64xf32>, vector<64x256xf32>, vector<16x256xf32> -> vector<16x256xf32>
    %6 = vector.extract_strided_slice %5 {offsets = [0, 0], sizes = [16, 128], strides = [1, 1]} : vector<16x256xf32> to vector<16x128xf32>
    %c0_7 = arith.constant 0 : index
    %c0_8 = arith.constant 0 : index
    %7 = vector.load %arg4[%c0_7, %c0_8] : memref<8x128xf32, #tpu.memory_space<vmem>>, vector<1x128xf32>
    %8 = vector.broadcast %7 : vector<1x128xf32> to vector<16x128xf32>
    %9 = arith.addf %6, %8 : vector<16x128xf32>
    %cst_9 = arith.constant 0.000000e+00 : f32
    %10 = vector.broadcast %cst_9 : f32 to vector<16x128xf32>
    %11 = arith.maximumf %9, %10 : vector<16x128xf32>
    %12 = vector.extract_strided_slice %5 {offsets = [0, 128], sizes = [16, 128], strides = [1, 1]} : vector<16x256xf32> to vector<16x128xf32>
    %cst_10 = arith.constant dense<0.000000e+00> : vector<16x128xf32>
    %13 = tpu.matmul %11, %2, %cst_10 {dimension_numbers = #tpu.dot_dimension_numbers<[1], [0], [0], [1], [0, 0, 1, 1], [], []>} : vector<16x128xf32>, vector<128x128xf32>, vector<16x128xf32> -> vector<16x128xf32>
    %14 = arith.addf %13, %12 : vector<16x128xf32>
    %c1 = arith.constant 1 : index
    %c0_11 = arith.constant 0 : index
    %15 = vector.load %arg4[%c1, %c0_11] : memref<8x128xf32, #tpu.memory_space<vmem>>, vector<1x128xf32>
    %16 = vector.broadcast %15 : vector<1x128xf32> to vector<16x128xf32>
    %17 = arith.addf %14, %16 : vector<16x128xf32>
    %cst_12 = arith.constant 0.000000e+00 : f32
    %18 = vector.broadcast %cst_12 : f32 to vector<16x128xf32>
    %19 = arith.maximumf %17, %18 : vector<16x128xf32>
    %cst_13 = arith.constant dense<0.000000e+00> : vector<16x128xf32>
    %20 = tpu.matmul %19, %3, %cst_13 {dimension_numbers = #tpu.dot_dimension_numbers<[1], [0], [0], [1], [0, 0, 1, 1], [], []>} : vector<16x128xf32>, vector<128x128xf32>, vector<16x128xf32> -> vector<16x128xf32>
    %c2 = arith.constant 2 : index
    %c0_14 = arith.constant 0 : index
    %21 = vector.load %arg4[%c2, %c0_14] : memref<8x128xf32, #tpu.memory_space<vmem>>, vector<1x128xf32>
    %22 = vector.broadcast %21 : vector<1x128xf32> to vector<16x128xf32>
    %23 = arith.addf %20, %22 : vector<16x128xf32>
    %cst_15 = arith.constant 0.000000e+00 : f32
    %24 = vector.broadcast %cst_15 : f32 to vector<16x128xf32>
    %25 = arith.maximumf %23, %24 : vector<16x128xf32>
    %cst_16 = arith.constant dense<0.000000e+00> : vector<16x128xf32>
    %26 = tpu.matmul %25, %4, %cst_16 {dimension_numbers = #tpu.dot_dimension_numbers<[1], [0], [0], [1], [0, 0, 1, 1], [], []>} : vector<16x128xf32>, vector<128x128xf32>, vector<16x128xf32> -> vector<16x128xf32>
    %c3 = arith.constant 3 : index
    %c0_17 = arith.constant 0 : index
    %27 = vector.load %arg4[%c3, %c0_17] : memref<8x128xf32, #tpu.memory_space<vmem>>, vector<1x128xf32>
    %28 = vector.broadcast %27 : vector<1x128xf32> to vector<16x128xf32>
    %29 = arith.addf %26, %28 : vector<16x128xf32>
    %c0_18 = arith.constant 0 : index
    %c0_19 = arith.constant 0 : index
    %30 = vector.load %arg5[%c0_18, %c0_19] : memref<16x128xf32, #tpu.memory_space<vmem>>, vector<16x128xf32>
    tpu.vector_store %arg5[%c0_18, %c0_19], %29 {strides = array<i32>} : memref<16x128xf32, #tpu.memory_space<vmem>>, vector<16x128xf32>,
    return
  }
  func.func @transform_0(%arg0: i32) -> (i32, i32) {
    %c0_i32 = arith.constant 0 : i32
    %c0_i32_0 = arith.constant 0 : i32
    return %arg0, %c0_i32 : i32, i32
  }
  func.func @transform_1(%arg0: i32) -> (i32, i32) {
    %c0_i32 = arith.constant 0 : i32
    %c0_i32_0 = arith.constant 0 : i32
    %c0_i32_1 = arith.constant 0 : i32
    return %c0_i32, %c0_i32_0 : i32, i32
  }
  func.func @transform_2(%arg0: i32) -> (i32, i32) {
    %c0_i32 = arith.constant 0 : i32
    %c0_i32_0 = arith.constant 0 : i32
    %c0_i32_1 = arith.constant 0 : i32
    return %c0_i32, %c0_i32_0 : i32, i32
  }
  func.func @transform_3(%arg0: i32) -> (i32, i32) {
    %c0_i32 = arith.constant 0 : i32
    %c0_i32_0 = arith.constant 0 : i32
    %c0_i32_1 = arith.constant 0 : i32
    return %c0_i32, %c0_i32_0 : i32, i32
  }
  func.func @transform_4(%arg0: i32) -> (i32, i32) {
    %c0_i32 = arith.constant 0 : i32
    %c0_i32_0 = arith.constant 0 : i32
    return %arg0, %c0_i32 : i32, i32
  }
}

</mosaic_0001>

<bundles_post_ra>
// kernel: tpu_custom_call.1
= control target key start
LH: loop header
LB: loop body
LE: loop exit
PB: predicated region body
PF: predicated region fallthrough
CT: control target
= control target key end

     0   :  { %9 = vsyncpa [#allocation3], 0  ;;  %s967_s0 = inlined_call_operand.hbm [shape: f32[16,64], index: 0, kind: input, shape index: {}]   ;;  %s968_s1 = inlined_call_operand.hbm [shape: f32[64,256], index: 1, kind: input, shape index: {}]   ;;  %s969_s2 = inlined_call_operand.hbm [shape: f32[384,128], index: 2, kind: input, shape index: {}]   ;;  %s970_s3 = inlined_call_operand.vmem [shape: f32[8,128], index: 3, kind: input, shape index: {}]   ;;  %s971_s4 = inlined_call_operand.hbm [shape: f32[16,128], index: 4, kind: output, shape index: {}]  }
   0x1   :  { %10 = vsyncpa [#allocation6], 0 }
   0x2   :  { %11 = vsyncpa [#allocation4], 0  ;;  %s864_s15 = smov [#allocation5]   ;;  %s770_s19 = scalar_lea.hbm %s968_s1, 2048 }
   0x3   :  { %s29_s16 = sshll.u32 %s864_s15, 4  ;;  %p771_p0 = scmp.ne.s32.totalorder %s968_s1, %s770_s19  ;;  %s30_s16 = int_to_ptr.vmem [resolvable:$true] %s29_s16 }
   0x4   :  { %p774_p1 = scmp.lt.u32.totalorder %s770_s19, %s968_s1 }
   0x6   :  { %p776_p2 = pnand %p774_p1, %p771_p0 }
   0x8   :  { %779 = shalt.err (!%p776_p2)
}
   0x9   :  { %s780_s24 = scalar_lea.vmem %s30_s16, 2048  ;;  %p785_p4 = scmp.lt.s32.totalorder %s30_s16, %s30_s16 }
   0xa   :  { %p781_p3 = scmp.ne.s32.totalorder %s30_s16, %s780_s24  ;;  %p786_p5 = scmp.lt.s32.totalorder %s780_s24, %s780_s24 }
   0xc   :  { %p787_p6 = por %p786_p5, %p785_p4 }
   0xe   :  { %p788_p7 = pnand %p787_p6, %p781_p3 }
  0x10   :  { %791 = shalt.err (!%p788_p7)
}
  0x11   :  { %s865_s25 = smov 256   ;;  %s866_s26 = smov 16  }
  0x12   :  { %35 = dma.hbm_to_vmem [thread:$0]  %s968_s1, 2048, %s30_s16, [#allocation6], %s865_s25, %s865_s25, %s866_s26  }
  0x13   :  { %s867_s29 = smov [#allocation2]   ;;  %s792_s7 = scalar_lea.hbm %s967_s0, 256 }
  0x14   :  { %s17_s30 = sshll.u32 %s867_s29, 4  ;;  %p793_p8 = scmp.ne.s32.totalorder %s967_s0, %s792_s7  ;;  %s18_s30 = int_to_ptr.vmem [resolvable:$true] %s17_s30 }
  0x15   :  { %p796_p9 = scmp.lt.u32.totalorder %s792_s7, %s967_s0 }
  0x17   :  { %p798_p10 = pnand %p796_p9, %p793_p8 }
  0x19   :  { %801 = shalt.err (!%p798_p10)
}
  0x1a   :  { %s802_s12 = scalar_lea.vmem %s18_s30, 256  ;;  %p807_p12 = scmp.lt.s32.totalorder %s18_s30, %s18_s30 }
  0x1b   :  { %p803_p11 = scmp.ne.s32.totalorder %s18_s30, %s802_s12  ;;  %p808_p13 = scmp.lt.s32.totalorder %s802_s12, %s802_s12 }
  0x1d   :  { %p809_p0 = por %p808_p13, %p807_p12 }
  0x1f   :  { %p810_p1 = pnand %p809_p0, %p803_p11 }
  0x21   :  { %813 = shalt.err (!%p810_p1)
}
  0x22   :  { %s868_s1 = smov 128   ;;  %s869_s13 = smov 8  }
  0x23   :  { %23 = dma.hbm_to_vmem [thread:$0]  %s967_s0, 256, %s18_s30, [#allocation3], %s868_s1, %s868_s1, %s869_s13  }
  0x24   :  { %s870_s16 = smov [#allocation7]   ;;  %s814_s20 = scalar_lea.hbm %s969_s2, 6144 }
  0x25   :  { %s41_s17 = sshll.u32 %s870_s16, 4  ;;  %p815_p2 = scmp.ne.s32.totalorder %s969_s2, %s814_s20  ;;  %s42_s17 = int_to_ptr.vmem [resolvable:$true] %s41_s17 }
  0x26   :  { %p818_p3 = scmp.lt.u32.totalorder %s814_s20, %s969_s2 }
  0x28   :  { %p820_p4 = pnand %p818_p3, %p815_p2 }
  0x2a   :  { %823 = shalt.err (!%p820_p4)
}
  0x2b   :  { %s824_s25 = scalar_lea.vmem %s42_s17, 6144  ;;  %p829_p6 = scmp.lt.s32.totalorder %s42_s17, %s42_s17 }
  0x2c   :  { %p825_p5 = scmp.ne.s32.totalorder %s42_s17, %s824_s25  ;;  %p830_p7 = scmp.lt.s32.totalorder %s824_s25, %s824_s25 }
  0x2e   :  { %p831_p8 = por %p830_p7, %p829_p6 }
  0x30   :  { %p832_p9 = pnand %p831_p8, %p825_p5 }
  0x32   :  { %835 = shalt.err (!%p832_p9)
}
  0x33   :  { %47 = dma.hbm_to_vmem [thread:$0]  %s969_s2, 6144, %s42_s17, [#allocation6], %s868_s1, %s868_s1, %s869_s13  }
  0x34   :  { %858 = dma.done.wait [#allocation3], 256  }
  0x35   :  { %859 = vsyncadd [#allocation3], 4294967040 }
  0x36   :  { %860 = dma.done.wait [#allocation6], 8192  }
  0x37   :  { %861 = vsyncadd [#allocation6], 4294959104  ;;  %v871_v0 = vmov 0.0   ;;  %v62_v1 = vld [vmem:[#allocation5 + $0x8] sm:$0xff]  ;;  %v64_v2 = vld [vmem:[#allocation5 + $0x18] sm:$0xff]  ;;  %vm125_vm0 = vcmask 523264  }
  0x38   :  { %196 = vmatprep.mubr.f32.mxu0 %v871_v0  ;;  %v61_v3 = vld [vmem:[#allocation5] sm:$0xff]  ;;  %v649_v4 = vpack.c.bf16 %v64_v2, %v62_v1  ;;  %v63_v5 = vld [vmem:[#allocation5 + $0x10] sm:$0xff]  ;;  %v66_v6 = vld [vmem:[#allocation5 + $0x28] sm:$0xff]  ;;  %s872_s8 = smov [#allocation8]  }
  0x39   :  { %v68_v7 = vld [vmem:[#allocation5 + $0x38] sm:$0xff]  ;;  %v651_v8 = vpack.c.bf16 %v63_v5, %v61_v3  ;;  %v65_v10 = vld [vmem:[#allocation5 + $0x20] sm:$0xff]  ;;  %v67_v11 = vld [vmem:[#allocation5 + $0x30] sm:$0xff]  ;;  %s471_s9 = sshll.u32 %s872_s8, 4  ;;  %s472_s9 = int_to_ptr.vmem [resolvable:$true] %s471_s9 }
  0x3a   :  { %v653_v9 = vpack.c.bf16 %v68_v7, %v66_v6  ;;  %v70_v12 = vld [vmem:[#allocation5 + $0x48] sm:$0xff]  ;;  %650 = vmatprep.subr.bf16.mxu0 %v649_v4  ;;  %v72_v13 = vld [vmem:[#allocation5 + $0x58] sm:$0xff]  ;;  %v655_v14 = vpack.c.bf16 %v67_v11, %v65_v10  ;;  %v69_v15 = vld [vmem:[#allocation5 + $0x40] sm:$0xff]  ;;  %s836_s10 = scalar_lea.vmem %s472_s9, 256  ;;  %p841_p11 = scmp.lt.s32.totalorder %s472_s9, %s472_s9 }
  0x3b   :  { %652 = vmatpush1.bf16.msra.mxu0 %v651_v8  ;;  %v657_v16 = vpack.c.bf16 %v72_v13, %v70_v12  ;;  %v71_v17 = vld [vmem:[#allocation5 + $0x50] sm:$0xff]  ;;  %v74_v18 = vld [vmem:[#allocation5 + $0x68] sm:$0xff]  ;;  %v76_v19 = vld [vmem:[#allocation5 + $0x78] sm:$0xff]  ;;  %p837_p10 = scmp.ne.s32.totalorder %s472_s9, %s836_s10  ;;  %p842_p12 = scmp.lt.s32.totalorder %s836_s10, %s836_s10 }
  0x3c   :  { %654 = vmatprep.subr.bf16.mxu0 %v653_v9  ;;  %v77_v20 = vld [vmem:[#allocation7] sm:$0xff]  ;;  %v78_v21 = vld [vmem:[#allocation7 + $0x8] sm:$0xff]  ;;  %v79_v22 = vld [vmem:[#allocation7 + $0x10] sm:$0xff]  ;;  %v659_v25 = vpack.c.bf16 %v71_v17, %v69_v15  ;;  %v661_v29 = vpack.c.bf16 %v76_v19, %v74_v18 }
  0x3d   :  { %v665_v23 = vpack.c.bf16 %v78_v21, %v77_v20  ;;  %v80_v24 = vld [vmem:[#allocation7 + $0x18] sm:$0xff]  ;;  %v81_v27 = vld [vmem:[#allocation7 + $0x20] sm:$0xff]  ;;  %v82_v28 = vld [vmem:[#allocation7 + $0x28] sm:$0xff]  ;;  %p843_p13 = por %p842_p12, %p841_p11 }
  0x3e   :  { %v669_v26 = vpack.c.bf16 %v80_v24, %v79_v22  ;;  %v73_v30 = vld [vmem:[#allocation5 + $0x60] sm:$0xff]  ;;  %v75_v31 = vld [vmem:[#allocation5 + $0x70] sm:$0xff]  ;;  %v673_v32 = vpack.c.bf16 %v82_v28, %v81_v27  ;;  %v84_v35 = vld [vmem:[#allocation7 + $0x38] sm:$0xff] }
  0x3f   :  { %656 = vmatpush1.bf16.msra.mxu0 %v655_v14  ;;  %666 = vmatprep.subr.bf16.mxu1 %v665_v23  ;;  %v663_v33 = vpack.c.bf16 %v75_v31, %v73_v30  ;;  %v83_v34 = vld [vmem:[#allocation7 + $0x30] sm:$0xff]  ;;  %v85_v38 = vld [vmem:[#allocation7 + $0x40] sm:$0xff]  ;;  %v86_v39 = vld [vmem:[#allocation7 + $0x48] sm:$0xff]  ;;  %p844_p0 = pnand %p843_p13, %p837_p10 }
  0x40   :  { %658 = vmatprep.subr.bf16.mxu0 %v657_v16  ;;  %668 = vmatpush3.bf16.msra.mxu1 %v665_v23  ;;  %v677_v36 = vpack.c.bf16 %v84_v35, %v83_v34  ;;  %v59_v37 = vld [vmem:[#allocation2] sm:$0xff]  ;;  %v681_v40 = vpack.c.bf16 %v86_v39, %v85_v38  ;;  %v60_v41 = vld [vmem:[#allocation2 + $0x8] sm:$0xff]  ;;  %v89_v45 = vld [vmem:[#allocation7 + $0x60] sm:$0xff] }
  0x41   :  { %670 = vmatprep.subr.bf16.mxu1 %v669_v26  ;;  %v87_v42 = vld [vmem:[#allocation7 + $0x50] sm:$0xff]  ;;  %v88_v43 = vld [vmem:[#allocation7 + $0x58] sm:$0xff]  ;;  %v90_v46 = vld [vmem:[#allocation7 + $0x68] sm:$0xff] }
  0x42   :  { %v685_v44 = vpack.c.bf16 %v88_v43, %v87_v42  ;;  %v689_v47 = vpack.c.bf16 %v90_v46, %v89_v45  ;;  %v91_v48 = vld [vmem:[#allocation7 + $0x70] sm:$0xff]  ;;  %v92_v49 = vld [vmem:[#allocation7 + $0x78] sm:$0xff]  ;;  %v93_v51 = vld [vmem:[#allocation7 + $0x80] sm:$0xff] }
  0x43   :  { %660 = vmatpush1.bf16.msra.mxu0 %v659_v25  ;;  %v693_v50 = vpack.c.bf16 %v92_v49, %v91_v48  ;;  %v94_v52 = vld [vmem:[#allocation7 + $0x88] sm:$0xff]  ;;  %v95_v53 = vld [vmem:[#allocation7 + $0x90] sm:$0xff]  ;;  %v96_v55 = vld [vmem:[#allocation7 + $0x98] sm:$0xff] }
  0x44   :  { %662 = vmatprep.subr.bf16.mxu0 %v661_v29  ;;  %672 = vmatpush3.bf16.msra.mxu1 %v669_v26  ;;  %v697_v54 = vpack.c.bf16 %v94_v52, %v93_v51  ;;  %v701_v56 = vpack.c.bf16 %v96_v55, %v95_v53  ;;  %v97_v57 = vld [vmem:[#allocation7 + $0xa0] sm:$0xff]  ;;  %v98_v58 = vld [vmem:[#allocation7 + $0xa8] sm:$0xff]  ;;  %v99_v60 = vld [vmem:[#allocation7 + $0xb0] sm:$0xff] }
  0x45   :  { %674 = vmatprep.subr.bf16.mxu1 %v673_v32  ;;  %v705_v59 = vpack.c.bf16 %v98_v58, %v97_v57  ;;  %v100_v61 = vld [vmem:[#allocation7 + $0xb8] sm:$0xff]  ;;  %v101_v63 = vld [vmem:[#allocation7 + $0xc0] sm:$0xff]  ;;  %v103_v2 = vld [vmem:[#allocation7 + $0xd0] sm:$0xff] }
  0x46   :  { %v709_v62 = vpack.c.bf16 %v100_v61, %v99_v60  ;;  %v104_v3 = vld [vmem:[#allocation7 + $0xd8] sm:$0xff]  ;;  %v486_v5 = vld [vmem:[%s970_s3] ss:$0 sm:$0xff]  ;;  %v105_v14 = vld [vmem:[#allocation7 + $0xe0] sm:$0xff] }
  0x47   :  { %664 = vmatpush1.bf16.msra.mxu0 %v663_v33  ;;  %v717_v4 = vpack.c.bf16 %v104_v3, %v103_v2  ;;  %v106_v15 = vld [vmem:[#allocation7 + $0xe8] sm:$0xff]  ;;  %v107_v17 = vld [vmem:[#allocation7 + $0xf0] sm:$0xff]  ;;  %v108_v18 = vld [vmem:[#allocation7 + $0xf8] sm:$0xff] }
  0x48   :  { %676 = vmatpush3.bf16.msra.mxu1 %v673_v32  ;;  %698 = vmatprep.subr.bf16.mxu0 %v697_v54  ;;  %v721_v16 = vpack.c.bf16 %v106_v15, %v105_v14  ;;  %v725_v19 = vpack.c.bf16 %v108_v18, %v107_v17  ;;  %v109_v20 = vld [vmem:[#allocation7 + $0x100] sm:$0xff]  ;;  %v110_v21 = vld [vmem:[#allocation7 + $0x108] sm:$0xff]  ;;  %v111_v22 = vld [vmem:[#allocation7 + $0x110] sm:$0xff] }
  0x49   :  { %678 = vmatprep.subr.bf16.mxu1 %v677_v36  ;;  %v729_v23 = vpack.c.bf16 %v110_v21, %v109_v20  ;;  %v112_v24 = vld [vmem:[#allocation7 + $0x118] sm:$0xff]  ;;  %v113_v26 = vld [vmem:[#allocation7 + $0x120] sm:$0xff]  ;;  %v114_v27 = vld [vmem:[#allocation7 + $0x128] sm:$0xff] }
  0x4a   :  { %484 = vmatmul.mubr.msk.f32.vlgmr.msra.gmra.mrb[0].mxu0 %vm125_vm0, %v59_v37  ;;  %v733_v25 = vpack.c.bf16 %v112_v24, %v111_v22  ;;  %v737_v28 = vpack.c.bf16 %v114_v27, %v113_v26  ;;  %v115_v29 = vld [vmem:[#allocation7 + $0x130] sm:$0xff]  ;;  %v116_v30 = vld [vmem:[#allocation7 + $0x138] sm:$0xff]  ;;  %v117_v32 = vld [vmem:[#allocation7 + $0x140] sm:$0xff] }
  0x4b   :  { %202 = vmatprep.mubr.f32.mxu0 %v871_v0  ;;  %700 = vmatpush3.bf16.msra.mxu0 %v697_v54  ;;  %v102_v0 = vld [vmem:[#allocation7 + $0xc8] sm:$0xff]  ;;  %v741_v31 = vpack.c.bf16 %v116_v30, %v115_v29  ;;  %v119_v35 = vld [vmem:[#allocation7 + $0x150] sm:$0xff]  ;;  %v121_v38 = vld [vmem:[#allocation7 + $0x160] sm:$0xff] }
  0x4c   :  { %680 = vmatpush3.bf16.msra.mxu1 %v677_v36  ;;  %702 = vmatprep.subr.bf16.mxu0 %v701_v56  ;;  %v713_v1 = vpack.c.bf16 %v102_v0, %v101_v63  ;;  %v118_v33 = vld [vmem:[#allocation7 + $0x148] sm:$0xff]  ;;  %v120_v36 = vld [vmem:[#allocation7 + $0x158] sm:$0xff]  ;;  %v487_v42 = vld [vmem:[%s970_s3 + $0x1] ss:$0 sm:$0xff] }
  0x4d   :  { %682 = vmatprep.subr.bf16.mxu1 %v681_v40  ;;  %v745_v34 = vpack.c.bf16 %v118_v33, %v117_v32  ;;  %v749_v37 = vpack.c.bf16 %v120_v36, %v119_v35  ;;  %v122_v39 = vld [vmem:[#allocation7 + $0x168] sm:$0xff]  ;;  %v124_v51 = vld [vmem:[#allocation7 + $0x178] sm:$0xff]  ;;  %v488_v53 = vld [vmem:[%s970_s3 + $0x2] ss:$0 sm:$0xff] }
  0x4e   :  { %485 = vmatmul.mubr.msk.f32.gmra.mrb[2].mxu0 %vm125_vm0, %v60_v41  ;;  %v489_v60 = vld [vmem:[%s970_s3 + $0x3] ss:$0 sm:$0xff] }
  0x4f   :  { %704 = vmatpush3.bf16.msra.mxu0 %v701_v56 }
  0x50   :  { %684 = vmatpush3.bf16.msra.mxu1 %v681_v40  ;;  %706 = vmatprep.subr.bf16.mxu0 %v705_v59  ;;  %v753_v40 = vpack.c.bf16 %v122_v39, %v121_v38 }
  0x51   :  { %686 = vmatprep.subr.bf16.mxu1 %v685_v44 }
  0x53   :  { %708 = vmatpush3.bf16.msra.mxu0 %v705_v59 }
  0x54   :  { %688 = vmatpush3.bf16.msra.mxu1 %v685_v44  ;;  %710 = vmatprep.subr.bf16.mxu0 %v709_v62 }
  0x55   :  { %690 = vmatprep.subr.bf16.mxu1 %v689_v47 }
  0x57   :  { %712 = vmatpush3.bf16.msra.mxu0 %v709_v62 }
  0x58   :  { %692 = vmatpush3.bf16.msra.mxu1 %v689_v47  ;;  %714 = vmatprep.subr.bf16.mxu0 %v713_v1 }
  0x59   :  { %694 = vmatprep.subr.bf16.mxu1 %v693_v50 }
  0x5b   :  { %716 = vmatpush3.bf16.msra.mxu0 %v713_v1 }
  0x5c   :  { %696 = vmatpush3.bf16.msra.mxu1 %v693_v50  ;;  %718 = vmatprep.subr.bf16.mxu0 %v717_v4  ;;  %v123_v50 = vld [vmem:[#allocation7 + $0x170] sm:$0xff] }
  0x5d   :  { %730 = vmatprep.subr.bf16.mxu1 %v729_v23  ;;  %v757_v52 = vpack.c.bf16 %v124_v51, %v123_v50 }
  0x5f   :  { %720 = vmatpush3.bf16.msra.mxu0 %v717_v4 }
  0x60   :  { %722 = vmatprep.subr.bf16.mxu0 %v721_v16 }
  0x63   :  { %724 = vmatpush3.bf16.msra.mxu0 %v721_v16 }
  0x64   :  { %726 = vmatprep.subr.bf16.mxu0 %v725_v19 }
  0x67   :  { %728 = vmatpush3.bf16.msra.mxu0 %v725_v19 }
 0x11d   :  { %v198_v6 = vpop.f32.mrb[0].mxu0 }
 0x11e   :  { %v200_v7 = vpop.f32.mrb[1].mxu0  ;;  %v214_v8 = vadd.f32 %v486_v5, %v198_v6 }
 0x120   :  { %v216_v9 = vmax.f32 %v214_v8, 0.0 }
 0x121   :  { %v204_v10 = vpop.f32.mrb[2].mxu0 }
 0x122   :  { %v215_v11 = vadd.f32 %v486_v5, %v204_v10  ;;  %v206_v12 = vpop.f32.mrb[3].mxu0  ;;  %576 = vmatprep.mubr.f32.mxu1 %v216_v9 }
 0x124   :  { %v217_v13 = vmax.f32 %v215_v11, 0.0 }
 0x126   :  { %577 = vmatmul.mubr.f32.vlgmr.msra.gmra.mrb[0].mxu1 %v217_v13 }
 0x127   :  { %732 = vmatpush3.bf16.msra.mxu1 %v729_v23 }
 0x128   :  { %734 = vmatprep.subr.bf16.mxu1 %v733_v25 }
 0x12b   :  { %736 = vmatpush3.bf16.msra.mxu1 %v733_v25 }
 0x12c   :  { %738 = vmatprep.subr.bf16.mxu1 %v737_v28 }
 0x12f   :  { %740 = vmatpush3.bf16.msra.mxu1 %v737_v28 }
 0x130   :  { %742 = vmatprep.subr.bf16.mxu1 %v741_v31 }
 0x133   :  { %744 = vmatpush3.bf16.msra.mxu1 %v741_v31 }
 0x134   :  { %746 = vmatprep.subr.bf16.mxu1 %v745_v34 }
 0x137   :  { %748 = vmatpush3.bf16.msra.mxu1 %v745_v34 }
 0x138   :  { %750 = vmatprep.subr.bf16.mxu1 %v749_v37 }
 0x13b   :  { %752 = vmatpush3.bf16.msra.mxu1 %v749_v37 }
 0x13c   :  { %754 = vmatprep.subr.bf16.mxu1 %v753_v40 }
 0x13f   :  { %756 = vmatpush3.bf16.msra.mxu1 %v753_v40 }
 0x140   :  { %758 = vmatprep.subr.bf16.mxu1 %v757_v52 }
 0x143   :  { %760 = vmatpush3.bf16.msra.mxu1 %v757_v52 }
 0x1f9   :  { %v578_v41 = vpop.f32.mrb[0].mxu1 }
 0x1fa   :  { %v290_v43 = vadd.f32 %v578_v41, %v206_v12  ;;  %v284_v44 = vpop.f32.mrb[1].mxu1 }
 0x1fb   :  { %v285_v45 = vadd.f32 %v284_v44, %v200_v7 }
 0x1fc   :  { %v299_v46 = vadd.f32 %v487_v42, %v290_v43 }
 0x1fd   :  { %v298_v47 = vadd.f32 %v487_v42, %v285_v45 }
 0x1fe   :  { %v301_v49 = vmax.f32 %v299_v46, 0.0 }
 0x1ff   :  { %v300_v48 = vmax.f32 %v298_v47, 0.0 }
 0x201   :  { %611 = vmatprep.mubr.f32.mxu0 %v300_v48 }
 0x202   :  { %612 = vmatmul.mubr.f32.vlgmr.msra.gmra.mrb[4].mxu0 %v301_v49 }
 0x2d5   :  { %v613_v54 = vpop.f32.mrb[4].mxu0 }
 0x2d6   :  { %v379_v55 = vadd.f32 %v613_v54, %v488_v53  ;;  %v373_v56 = vpop.f32.mrb[5].mxu0 }
 0x2d7   :  { %v374_v57 = vadd.f32 %v488_v53, %v373_v56 }
 0x2d8   :  { %v383_v59 = vmax.f32 %v379_v55, 0.0 }
 0x2d9   :  { %v382_v58 = vmax.f32 %v374_v57, 0.0 }
 0x2db   :  { %646 = vmatprep.mubr.f32.mxu1 %v382_v58 }
 0x2dc   :  { %647 = vmatmul.mubr.f32.vlgmr.msra.gmra.mrb[2].mxu1 %v383_v59 }
 0x3af   :  { %v648_v61 = vpop.f32.mrb[2].mxu1 }
 0x3b0   :  { %v461_v62 = vadd.f32 %v648_v61, %v489_v60  ;;  %v455_v63 = vpop.f32.mrb[3].mxu1 }
 0x3b1   :  { %v456_v0 = vadd.f32 %v489_v60, %v455_v63 }
 0x3b2   :  { %465 = vst [vmem:[#allocation8 + $0x8] sm:$0xff] %v461_v62 }
 0x3b3   :  { %464 = vst [vmem:[#allocation8] sm:$0xff] %v456_v0 }
 0x3b4   :  { %847 = shalt.err (!%p844_p0)
}
 0x3b5   :  { %s848_s3 = scalar_lea.hbm %s971_s4, 256 }
 0x3b6   :  { %p849_p1 = scmp.ne.s32.totalorder %s971_s4, %s848_s3  ;;  %p852_p2 = scmp.lt.u32.totalorder %s848_s3, %s971_s4 }
 0x3b8   :  { %p854_p3 = pnand %p852_p2, %p849_p1 }
 0x3ba   :  { %857 = shalt.err (!%p854_p3)
}
 0x3bb   :  { %477 = dma.vmem_to_hbm [thread:$0]  %s472_s9, 256, %s971_s4, [#allocation4], %s868_s1, %s868_s1, %s869_s13  }
 0x3bc   :  { %862 = dma.done.wait [#allocation4], 256  }
 0x3bd   :  { %863 = vsyncadd [#allocation4], 4294967040 }
 0x3be   :  { %481 = vsyncpa [#allocation3], 1 }
 0x3bf   :  { %482 = vsyncpa [#allocation6], 1 }
 0x3c0   :  { %483 = vsyncpa [#allocation4], 1 }

</bundles_post_ra>
